<compile_context>
chip_gen: v7x
topology: tpu7x:2x2x1
jax: 0.10.0
libtpu: 0.0.40
codegen_flags: <defaults>
</compile_context>

<pallas_src>
import jax
import jax.numpy as jnp
from jax.experimental import pallas as pl
from jax.experimental.pallas import tpu as pltpu


def _leaky_relu(x, negative_slope=0.01):
    return jnp.where(x >= 0, x, negative_slope * x)


def _round_up(n, m):
    return (n + m - 1) // m * m


def mlp_kernel(x_ref, w1_ref, b1_ref, w2_ref, b2_ref, w3_ref, b3_ref, o_ref):
    x = x_ref[...]                                    # (TB, 400)

    # layer 1: (TB,400) @ (400,20) + (1,20); dropout(eval) = identity
    h = jnp.dot(x, w1_ref[...], preferred_element_type=jnp.float32) + b1_ref[...]
    h = _leaky_relu(h)

    # layer 2: (TB,20) @ (20,20) + (1,20); dropout(eval) = identity
    h = jnp.dot(h, w2_ref[...], preferred_element_type=jnp.float32) + b2_ref[...]
    h = _leaky_relu(h)

    # layer 3: (TB,20) @ (20,1) + (1,1)
    out = jnp.dot(h, w3_ref[...], preferred_element_type=jnp.float32) + b3_ref[...]
    o_ref[...] = out.astype(o_ref.dtype)              # (TB, 1)


def mlp_forward(x, params, *, tb=1024):
    """x: (B, 400) float32.  Returns output matching torch's x.squeeze()."""
    w1, b1, w2, b2, w3, b3 = params
    B, F_in = x.shape

    # Batch tile: multiple of 8 sublanes, capped so the double-buffered x tile
    # fits every generation's scoped VMEM with plenty of headroom.
    TB = min(_round_up(max(tb, 8), 8), _round_up(B, 8))
    Bp = _round_up(B, TB)
    if Bp != B:
        x = jnp.pad(x, ((0, Bp - B), (0, 0)))
    num_tiles = Bp // TB

    # x / out stream over the batch grid; weights pinned (constant index_map).
    x_spec = pl.BlockSpec((TB, F_in), lambda i: (i, 0))
    out_spec = pl.BlockSpec((TB, 1), lambda i: (i, 0))
    pinned = lambda shape: pl.BlockSpec(shape, lambda i: (0, 0))

    out = pl.pallas_call(
        mlp_kernel,
        out_shape=jax.ShapeDtypeStruct((Bp, 1), jnp.float32),
        grid=(num_tiles,),
        in_specs=[
            x_spec,
            pinned(w1.shape), pinned(b1.shape),
            pinned(w2.shape), pinned(b2.shape),
            pinned(w3.shape), pinned(b3.shape),
        ],
        out_specs=out_spec,
        compiler_params=pltpu.CompilerParams(
            dimension_semantics=("parallel",),
        ),
    )(x, w1, b1, w2, b2, w3, b3)

    out = out[:B]
    return jnp.squeeze(out)


def init_params(key):
    """Deterministic init matching nn.Linear shapes (uniform +-1/sqrt(fan_in))."""
    ks = jax.random.split(key, 6)

    def lin(kw, kb, fan_in, fan_out):
        bound = 1.0 / jnp.sqrt(jnp.float32(fan_in))
        w = jax.random.uniform(kw, (fan_in, fan_out), jnp.float32, -bound, bound)
        b = jax.random.uniform(kb, (1, fan_out), jnp.float32, -bound, bound)
        return w, b

    w1, b1 = lin(ks[0], ks[1], 400, 20)
    w2, b2 = lin(ks[2], ks[3], 20, 20)
    w3, b3 = lin(ks[4], ks[5], 20, 1)
    return (w1, b1, w2, b2, w3, b3)


def _reference(x, params):
    hp = jax.lax.Precision.HIGHEST
    w1, b1, w2, b2, w3, b3 = params
    h = _leaky_relu(jnp.dot(x, w1, precision=hp) + b1)
    h = _leaky_relu(jnp.dot(h, w2, precision=hp) + b2)
    return jnp.squeeze(jnp.dot(h, w3, precision=hp) + b3)


if __name__ == "__main__":
    key = jax.random.PRNGKey(0)
    kp, kx1, kx2 = jax.random.split(key, 3)

    params = init_params(kp)

    # Case 1: small batch, single tile.
    x1 = jax.random.normal(kx1, (64, 400), jnp.float32)
    y1 = jax.block_until_ready(mlp_forward(x1, params))
    y1_ref = _reference(x1, params)
    assert y1.shape == (64,), y1.shape
    assert jnp.allclose(y1, y1_ref, atol=1e-2, rtol=1e-2), float(
        jnp.max(jnp.abs(y1 - y1_ref)))

    # Case 2: batch not divisible by the tile -> exercises padding + multi-tile grid.
    x2 = jax.random.normal(kx2, (20, 400), jnp.float32)
    y2 = jax.block_until_ready(mlp_forward(x2, params, tb=16))
    y2_ref = _reference(x2, params)
    assert y2.shape == (20,), y2.shape
    assert jnp.allclose(y2, y2_ref, atol=1e-2, rtol=1e-2), float(
        jnp.max(jnp.abs(y2 - y2_ref)))

    print("KERNEL_OK")
</pallas_src>

<mosaic_0001>
module attributes {stable_mosaic.version = 11 : i64} {
  func.func @mlp_kernel(%arg0: i32, %arg1: memref<64x400xf32, #tpu.memory_space<vmem>>, %arg2: memref<400x20xf32, #tpu.memory_space<vmem>>, %arg3: memref<1x20xf32, #tpu.memory_space<vmem>>, %arg4: memref<20x20xf32, #tpu.memory_space<vmem>>, %arg5: memref<1x20xf32, #tpu.memory_space<vmem>>, %arg6: memref<20x1xf32, #tpu.memory_space<vmem>>, %arg7: memref<1x1xf32, #tpu.memory_space<vmem>>, %arg8: memref<64x1xf32, #tpu.memory_space<vmem>>) attributes {dimension_semantics = [#tpu.dimension_semantics<parallel>], iteration_bounds = array<i64: 1>, scalar_prefetch = 0 : i64, scratch_operands = 0 : i64, tpu.core_type = #tpu.core_type<tc>, window_params = [{transform_indices = @transform_0, window_bounds = array<i64: 64, 400>}, {pipeline_mode = #tpu.pipeline_mode<synchronous>, transform_indices = @transform_1, window_bounds = array<i64: 400, 20>}, {pipeline_mode = #tpu.pipeline_mode<synchronous>, transform_indices = @transform_2, window_bounds = array<i64: 1, 20>}, {pipeline_mode = #tpu.pipeline_mode<synchronous>, transform_indices = @transform_3, window_bounds = array<i64: 20, 20>}, {pipeline_mode = #tpu.pipeline_mode<synchronous>, transform_indices = @transform_4, window_bounds = array<i64: 1, 20>}, {pipeline_mode = #tpu.pipeline_mode<synchronous>, transform_indices = @transform_5, window_bounds = array<i64: 20, 1>}, {pipeline_mode = #tpu.pipeline_mode<synchronous>, transform_indices = @transform_6, window_bounds = array<i64: 1, 1>}, {transform_indices = @transform_7, window_bounds = array<i64: 64, 1>}]} {
    %c0 = arith.constant 0 : index
    %c0_0 = arith.constant 0 : index
    %0 = vector.load %arg1[%c0, %c0_0] : memref<64x400xf32, #tpu.memory_space<vmem>>, vector<64x400xf32>
    %c0_1 = arith.constant 0 : index
    %c0_2 = arith.constant 0 : index
    %1 = vector.load %arg2[%c0_1, %c0_2] : memref<400x20xf32, #tpu.memory_space<vmem>>, vector<400x20xf32>
    %cst = arith.constant dense<0.000000e+00> : vector<64x20xf32>
    %2 = tpu.matmul %0, %1, %cst {dimension_numbers = #tpu.dot_dimension_numbers<[1], [0], [0], [1], [0, 0, 1, 1], [], []>} : vector<64x400xf32>, vector<400x20xf32>, vector<64x20xf32> -> vector<64x20xf32>
    %c0_3 = arith.constant 0 : index
    %c0_4 = arith.constant 0 : index
    %3 = vector.load %arg3[%c0_3, %c0_4] : memref<1x20xf32, #tpu.memory_space<vmem>>, vector<1x20xf32>
    %4 = vector.broadcast %3 : vector<1x20xf32> to vector<64x20xf32>
    %5 = arith.addf %2, %4 : vector<64x20xf32>
    %cst_5 = arith.constant 0.000000e+00 : f32
    %6 = vector.broadcast %cst_5 : f32 to vector<64x20xf32>
    %7 = arith.cmpf oge, %5, %6 : vector<64x20xf32>
    %cst_6 = arith.constant 0.00999999977 : f32
    %8 = vector.broadcast %cst_6 : f32 to vector<64x20xf32>
    %9 = arith.mulf %8, %5 : vector<64x20xf32>
    %10 = arith.select %7, %5, %9 : vector<64x20xi1>, vector<64x20xf32>
    %c0_7 = arith.constant 0 : index
    %c0_8 = arith.constant 0 : index
    %11 = vector.load %arg4[%c0_7, %c0_8] : memref<20x20xf32, #tpu.memory_space<vmem>>, vector<20x20xf32>
    %cst_9 = arith.constant dense<0.000000e+00> : vector<64x20xf32>
    %12 = tpu.matmul %10, %11, %cst_9 {dimension_numbers = #tpu.dot_dimension_numbers<[1], [0], [0], [1], [0, 0, 1, 1], [], []>} : vector<64x20xf32>, vector<20x20xf32>, vector<64x20xf32> -> vector<64x20xf32>
    %c0_10 = arith.constant 0 : index
    %c0_11 = arith.constant 0 : index
    %13 = vector.load %arg5[%c0_10, %c0_11] : memref<1x20xf32, #tpu.memory_space<vmem>>, vector<1x20xf32>
    %14 = vector.broadcast %13 : vector<1x20xf32> to vector<64x20xf32>
    %15 = arith.addf %12, %14 : vector<64x20xf32>
    %cst_12 = arith.constant 0.000000e+00 : f32
    %16 = vector.broadcast %cst_12 : f32 to vector<64x20xf32>
    %17 = arith.cmpf oge, %15, %16 : vector<64x20xf32>
    %cst_13 = arith.constant 0.00999999977 : f32
    %18 = vector.broadcast %cst_13 : f32 to vector<64x20xf32>
    %19 = arith.mulf %18, %15 : vector<64x20xf32>
    %20 = arith.select %17, %15, %19 : vector<64x20xi1>, vector<64x20xf32>
    %c0_14 = arith.constant 0 : index
    %c0_15 = arith.constant 0 : index
    %21 = vector.load %arg6[%c0_14, %c0_15] : memref<20x1xf32, #tpu.memory_space<vmem>>, vector<20x1xf32>
    %cst_16 = arith.constant dense<0.000000e+00> : vector<64x1xf32>
    %22 = tpu.matmul %20, %21, %cst_16 {dimension_numbers = #tpu.dot_dimension_numbers<[1], [0], [0], [1], [0, 0, 1, 1], [], []>} : vector<64x20xf32>, vector<20x1xf32>, vector<64x1xf32> -> vector<64x1xf32>
    %c0_17 = arith.constant 0 : index
    %c0_18 = arith.constant 0 : index
    %23 = vector.load %arg7[%c0_17, %c0_18] : memref<1x1xf32, #tpu.memory_space<vmem>>, vector<1x1xf32>
    %24 = vector.broadcast %23 : vector<1x1xf32> to vector<64x1xf32>
    %25 = arith.addf %22, %24 : vector<64x1xf32>
    %c0_19 = arith.constant 0 : index
    %c0_20 = arith.constant 0 : index
    %26 = vector.load %arg8[%c0_19, %c0_20] : memref<64x1xf32, #tpu.memory_space<vmem>>, vector<64x1xf32>
    tpu.vector_store %arg8[%c0_19, %c0_20], %25 {strides = array<i32>} : memref<64x1xf32, #tpu.memory_space<vmem>>, vector<64x1xf32>,
    return
  }
  func.func @transform_0(%arg0: i32) -> (i32, i32) {
    %c0_i32 = arith.constant 0 : i32
    %c0_i32_0 = arith.constant 0 : i32
    return %arg0, %c0_i32 : i32, i32
  }
  func.func @transform_1(%arg0: i32) -> (i32, i32) {
    %c0_i32 = arith.constant 0 : i32
    %c0_i32_0 = arith.constant 0 : i32
    %c0_i32_1 = arith.constant 0 : i32
    return %c0_i32, %c0_i32_0 : i32, i32
  }
  func.func @transform_2(%arg0: i32) -> (i32, i32) {
    %c0_i32 = arith.constant 0 : i32
    %c0_i32_0 = arith.constant 0 : i32
    %c0_i32_1 = arith.constant 0 : i32
    return %c0_i32, %c0_i32_0 : i32, i32
  }
  func.func @transform_3(%arg0: i32) -> (i32, i32) {
    %c0_i32 = arith.constant 0 : i32
    %c0_i32_0 = arith.constant 0 : i32
    %c0_i32_1 = arith.constant 0 : i32
    return %c0_i32, %c0_i32_0 : i32, i32
  }
  func.func @transform_4(%arg0: i32) -> (i32, i32) {
    %c0_i32 = arith.constant 0 : i32
    %c0_i32_0 = arith.constant 0 : i32
    %c0_i32_1 = arith.constant 0 : i32
    return %c0_i32, %c0_i32_0 : i32, i32
  }
  func.func @transform_5(%arg0: i32) -> (i32, i32) {
    %c0_i32 = arith.constant 0 : i32
    %c0_i32_0 = arith.constant 0 : i32
    %c0_i32_1 = arith.constant 0 : i32
    return %c0_i32, %c0_i32_0 : i32, i32
  }
  func.func @transform_6(%arg0: i32) -> (i32, i32) {
    %c0_i32 = arith.constant 0 : i32
    %c0_i32_0 = arith.constant 0 : i32
    %c0_i32_1 = arith.constant 0 : i32
    return %c0_i32, %c0_i32_0 : i32, i32
  }
  func.func @transform_7(%arg0: i32) -> (i32, i32) {
    %c0_i32 = arith.constant 0 : i32
    %c0_i32_0 = arith.constant 0 : i32
    return %arg0, %c0_i32 : i32, i32
  }
}

</mosaic_0001>

<bundles_post_ra>
// kernel: tpu_custom_call.1
= control target key start
LH: loop header
LB: loop body
LE: loop exit
PB: predicated region body
PF: predicated region fallthrough
CT: control target
= control target key end

     0   :  { %v910_v2 = vmov 0.0|0.0   ;;  %vm117_vm0 = vcmask 130048   ;;  %vm411_vm1 = vcmask 1043456   ;;  %vm386_vm3 = vcmask 162816   ;;  %s1303_s1 = inlined_call_operand.vmem [shape: f32[400,20], index: 1, kind: input, shape index: {}]   ;;  %s1304_s0 = inlined_call_operand.vmem [shape: f32[64,400], index: 0, kind: input, shape index: {}]   ;;  %s1305_s3 = inlined_call_operand.vmem [shape: f32[20,20], index: 3, kind: input, shape index: {}]   ;;  %s1306_s5 = inlined_call_operand.vmem [shape: f32[20,1], index: 5, kind: input, shape index: {}]   ;;  %s1307_s2 = inlined_call_operand.vmem [shape: f32[1,20], index: 2, kind: input, shape index: {}]   ;;  %s1308_s6 = inlined_call_operand.<no memory space> [shape: f32[1,1], index: 6, kind: input, shape index: {}]   ;;  %s1309_s4 = inlined_call_operand.vmem [shape: f32[1,20], index: 4, kind: input, shape index: {}]   ;;  %s1310_s7 = inlined_call_operand.vmem [shape: f32[64,1], index: 7, kind: output, shape index: {}]  }
   0x1   :  { %v76_v0 = vld [vmem:[%s1303_s1 + $0x80] sm:$0xff]  ;;  %v77_v1 = vld [vmem:[%s1303_s1 + $0x88] sm:$0xff]  ;;  %874 = vmatprep.subr.bf16.mxu1 %v910_v2  ;;  %v78_v10 = vld [vmem:[%s1303_s1 + $0x90] sm:$0xff] }
   0x2   :  { %v60_v3 = vld [vmem:[%s1303_s1] sm:$0xff]  ;;  %v842_v4 = vpack.c.bf16 %v77_v1, %v76_v0  ;;  %v61_v5 = vld [vmem:[%s1303_s1 + $0x8] sm:$0xff]  ;;  %v79_v11 = vld [vmem:[%s1303_s1 + $0x98] sm:$0xff] }
   0x3   :  { %v92_v6 = vld [vmem:[%s1303_s1 + $0x100] sm:$0xff]  ;;  %v93_v7 = vld [vmem:[%s1303_s1 + $0x108] sm:$0xff]  ;;  %v844_v8 = vpack.c.bf16 %v61_v5, %v60_v3  ;;  %v62_v12 = vld [vmem:[%s1303_s1 + $0x10] sm:$0xff]  ;;  %v846_v13 = vpack.c.bf16 %v79_v11, %v78_v10 }
   0x4   :  { %v875_v9 = vpack.c.bf16 %v93_v7, %v92_v6  ;;  %843 = vmatprep.subr.bf16.mxu0 %v842_v4  ;;  %v63_v14 = vld [vmem:[%s1303_s1 + $0x18] sm:$0xff]  ;;  %v94_v15 = vld [vmem:[%s1303_s1 + $0x110] sm:$0xff]  ;;  %v80_v19 = vld [vmem:[%s1303_s1 + $0xa0] sm:$0xff] }
   0x5   :  { %v95_v16 = vld [vmem:[%s1303_s1 + $0x118] sm:$0xff]  ;;  %845 = vmatpush3.bf16.msra.mxu0 %v844_v8  ;;  %v848_v17 = vpack.c.bf16 %v63_v14, %v62_v12  ;;  %v81_v20 = vld [vmem:[%s1303_s1 + $0xa8] sm:$0xff]  ;;  %v64_v21 = vld [vmem:[%s1303_s1 + $0x20] sm:$0xff] }
   0x6   :  { %876 = vmatpush1.bf16.msra.mxu1 %v875_v9  ;;  %v878_v18 = vpack.c.bf16 %v95_v16, %v94_v15  ;;  %847 = vmatprep.subr.bf16.mxu0 %v846_v13  ;;  %v850_v22 = vpack.c.bf16 %v81_v20, %v80_v19  ;;  %v65_v23 = vld [vmem:[%s1303_s1 + $0x28] sm:$0xff]  ;;  %v96_v24 = vld [vmem:[%s1303_s1 + $0x120] sm:$0xff]  ;;  %v82_v26 = vld [vmem:[%s1303_s1 + $0xb0] sm:$0xff] }
   0x7   :  { %877 = vmatprep.subr.bf16.mxu1 %v910_v2  ;;  %v97_v25 = vld [vmem:[%s1303_s1 + $0x128] sm:$0xff]  ;;  %v83_v27 = vld [vmem:[%s1303_s1 + $0xb8] sm:$0xff]  ;;  %v852_v28 = vpack.c.bf16 %v65_v23, %v64_v21  ;;  %v66_v30 = vld [vmem:[%s1303_s1 + $0x30] sm:$0xff] }
   0x8   :  { %v881_v29 = vpack.c.bf16 %v97_v25, %v96_v24  ;;  %v854_v31 = vpack.c.bf16 %v83_v27, %v82_v26  ;;  %v67_v32 = vld [vmem:[%s1303_s1 + $0x38] sm:$0xff]  ;;  %v98_v33 = vld [vmem:[%s1303_s1 + $0x130] sm:$0xff]  ;;  %v84_v35 = vld [vmem:[%s1303_s1 + $0xc0] sm:$0xff] }
   0x9   :  { %849 = vmatpush3.bf16.msra.mxu0 %v848_v17  ;;  %v99_v34 = vld [vmem:[%s1303_s1 + $0x138] sm:$0xff]  ;;  %v85_v36 = vld [vmem:[%s1303_s1 + $0xc8] sm:$0xff]  ;;  %v856_v37 = vpack.c.bf16 %v67_v32, %v66_v30  ;;  %v68_v39 = vld [vmem:[%s1303_s1 + $0x40] sm:$0xff] }
   0xa   :  { %879 = vmatpush1.bf16.msra.mxu1 %v878_v18  ;;  %851 = vmatprep.subr.bf16.mxu0 %v850_v22  ;;  %v884_v38 = vpack.c.bf16 %v99_v34, %v98_v33  ;;  %v858_v40 = vpack.c.bf16 %v85_v36, %v84_v35  ;;  %v69_v41 = vld [vmem:[%s1303_s1 + $0x48] sm:$0xff]  ;;  %v100_v42 = vld [vmem:[%s1303_s1 + $0x140] sm:$0xff]  ;;  %v86_v44 = vld [vmem:[%s1303_s1 + $0xd0] sm:$0xff] }
   0xb   :  { %880 = vmatprep.subr.bf16.mxu1 %v910_v2  ;;  %v101_v43 = vld [vmem:[%s1303_s1 + $0x148] sm:$0xff]  ;;  %v87_v45 = vld [vmem:[%s1303_s1 + $0xd8] sm:$0xff]  ;;  %v860_v46 = vpack.c.bf16 %v69_v41, %v68_v39  ;;  %v70_v48 = vld [vmem:[%s1303_s1 + $0x50] sm:$0xff] }
   0xc   :  { %v887_v47 = vpack.c.bf16 %v101_v43, %v100_v42  ;;  %v71_v49 = vld [vmem:[%s1303_s1 + $0x58] sm:$0xff]  ;;  %v29_v50 = vld [vmem:[%s1304_s0 + $0x8] sm:$0xff]  ;;  %v862_v51 = vpack.c.bf16 %v87_v45, %v86_v44  ;;  %v102_v52 = vld [vmem:[%s1303_s1 + $0x150] sm:$0xff] }
   0xd   :  { %853 = vmatpush3.bf16.msra.mxu0 %v852_v28  ;;  %v103_v53 = vld [vmem:[%s1303_s1 + $0x158] sm:$0xff]  ;;  %v88_v55 = vld [vmem:[%s1303_s1 + $0xe0] sm:$0xff]  ;;  %v89_v56 = vld [vmem:[%s1303_s1 + $0xe8] sm:$0xff]  ;;  %206 = vmatprep.mubr.f32.mxu0 %v29_v50  ;;  %v864_v57 = vpack.c.bf16 %v71_v49, %v70_v48 }
   0xe   :  { %882 = vmatpush1.bf16.msra.mxu1 %v881_v29  ;;  %855 = vmatprep.subr.bf16.mxu0 %v854_v31  ;;  %v31_v54 = vld [vmem:[%s1304_s0 + $0x18] sm:$0xff]  ;;  %v890_v58 = vpack.c.bf16 %v103_v53, %v102_v52  ;;  %v72_v59 = vld [vmem:[%s1303_s1 + $0x60] sm:$0xff]  ;;  %v866_v60 = vpack.c.bf16 %v89_v56, %v88_v55  ;;  %v73_v61 = vld [vmem:[%s1303_s1 + $0x68] sm:$0xff] }
   0xf   :  { %883 = vmatprep.subr.bf16.mxu1 %v910_v2  ;;  %700 = vmatprep.mubr.msk.f32.mxu1 %vm117_vm0, %v31_v54  ;;  %v104_v62 = vld [vmem:[%s1303_s1 + $0x160] sm:$0xff]  ;;  %v105_v63 = vld [vmem:[%s1303_s1 + $0x168] sm:$0xff]  ;;  %v90_v0 = vld [vmem:[%s1303_s1 + $0xf0] sm:$0xff]  ;;  %v868_v3 = vpack.c.bf16 %v73_v61, %v72_v59 }
  0x10   :  { %v91_v1 = vld [vmem:[%s1303_s1 + $0xf8] sm:$0xff]  ;;  %v893_v4 = vpack.c.bf16 %v105_v63, %v104_v62  ;;  %v74_v5 = vld [vmem:[%s1303_s1 + $0x70] sm:$0xff]  ;;  %v376_v10 = vld [vmem:[%s1305_s3] sm:$0xff] }
  0x11   :  { %857 = vmatpush3.bf16.msra.mxu0 %v856_v37  ;;  %v870_v6 = vpack.c.bf16 %v91_v1, %v90_v0  ;;  %v75_v7 = vld [vmem:[%s1303_s1 + $0x78] sm:$0xff]  ;;  %v106_v8 = vld [vmem:[%s1303_s1 + $0x170] sm:$0xff]  ;;  %v377_v11 = vld [vmem:[%s1305_s3 + $0x8] sm:$0xff] }
  0x12   :  { %885 = vmatpush1.bf16.msra.mxu1 %v884_v38  ;;  %859 = vmatprep.subr.bf16.mxu0 %v858_v40  ;;  %v107_v9 = vld [vmem:[%s1303_s1 + $0x178] sm:$0xff]  ;;  %v872_v12 = vpack.c.bf16 %v75_v7, %v74_v5  ;;  %v108_v14 = vld [vmem:[%s1303_s1 + $0x180] sm:$0xff]  ;;  %v109_v15 = vld [vmem:[%s1303_s1 + $0x188] sm:$0xff]  ;;  %v901_v16 = vpack.c.bf16 %v377_v11, %v376_v10 }
  0x13   :  { %886 = vmatprep.subr.bf16.mxu1 %v910_v2  ;;  %v896_v13 = vpack.c.bf16 %v107_v9, %v106_v8  ;;  %v28_v17 = vld [vmem:[%s1304_s0] sm:$0xff]  ;;  %v899_v18 = vpack.c.bf16 %v109_v15, %v108_v14  ;;  %v33_v19 = vld [vmem:[%s1304_s0 + $0x28] sm:$0xff]  ;;  %v30_v21 = vld [vmem:[%s1304_s0 + $0x10] sm:$0xff] }
  0x14   :  { %v32_v20 = vld [vmem:[%s1304_s0 + $0x20] sm:$0xff]  ;;  %v35_v22 = vld [vmem:[%s1304_s0 + $0x38] sm:$0xff]  ;;  %v34_v24 = vld [vmem:[%s1304_s0 + $0x30] sm:$0xff] }
  0x15   :  { %861 = vmatpush3.bf16.msra.mxu0 %v860_v46  ;;  %v36_v23 = vld [vmem:[%s1304_s0 + $0x40] sm:$0xff]  ;;  %v41_v25 = vld [vmem:[%s1304_s0 + $0x68] sm:$0xff]  ;;  %v39_v26 = vld [vmem:[%s1304_s0 + $0x58] sm:$0xff] }
  0x16   :  { %888 = vmatpush1.bf16.msra.mxu1 %v887_v47  ;;  %863 = vmatprep.subr.bf16.mxu0 %v862_v51  ;;  %v40_v27 = vld [vmem:[%s1304_s0 + $0x60] sm:$0xff]  ;;  %v38_v28 = vld [vmem:[%s1304_s0 + $0x50] sm:$0xff]  ;;  %v45_v29 = vld [vmem:[%s1304_s0 + $0x88] sm:$0xff] }
  0x17   :  { %889 = vmatprep.subr.bf16.mxu1 %v910_v2  ;;  %v43_v30 = vld [vmem:[%s1304_s0 + $0x78] sm:$0xff]  ;;  %v44_v31 = vld [vmem:[%s1304_s0 + $0x80] sm:$0xff]  ;;  %v42_v32 = vld [vmem:[%s1304_s0 + $0x70] sm:$0xff] }
  0x18   :  { %v49_v33 = vld [vmem:[%s1304_s0 + $0xa8] sm:$0xff]  ;;  %v47_v34 = vld [vmem:[%s1304_s0 + $0x98] sm:$0xff]  ;;  %v48_v35 = vld [vmem:[%s1304_s0 + $0xa0] sm:$0xff] }
  0x19   :  { %865 = vmatpush3.bf16.msra.mxu0 %v864_v57  ;;  %v46_v36 = vld [vmem:[%s1304_s0 + $0x90] sm:$0xff]  ;;  %v53_v37 = vld [vmem:[%s1304_s0 + $0xc8] sm:$0xff]  ;;  %v51_v38 = vld [vmem:[%s1304_s0 + $0xb8] sm:$0xff] }
  0x1a   :  { %891 = vmatpush1.bf16.msra.mxu1 %v890_v58  ;;  %867 = vmatprep.subr.bf16.mxu0 %v866_v60  ;;  %v52_v39 = vld [vmem:[%s1304_s0 + $0xc0] sm:$0xff]  ;;  %v50_v40 = vld [vmem:[%s1304_s0 + $0xb0] sm:$0xff]  ;;  %v57_v41 = vld [vmem:[%s1304_s0 + $0xe8] sm:$0xff] }
  0x1b   :  { %892 = vmatprep.subr.bf16.mxu1 %v910_v2  ;;  %v55_v42 = vld [vmem:[%s1304_s0 + $0xd8] sm:$0xff]  ;;  %v56_v43 = vld [vmem:[%s1304_s0 + $0xe0] sm:$0xff]  ;;  %v54_v44 = vld [vmem:[%s1304_s0 + $0xd0] sm:$0xff] }
  0x1c   :  { %v59_v45 = vld [vmem:[%s1304_s0 + $0xf8] sm:$0xff]  ;;  %v58_v46 = vld [vmem:[%s1304_s0 + $0xf0] sm:$0xff]  ;;  %v544_v48 = vld [vmem:[%s1306_s5] sm:$0xff] }
  0x1d   :  { %869 = vmatpush3.bf16.msra.mxu0 %v868_v3  ;;  %v378_v47 = vld [vmem:[%s1305_s3 + $0x10] sm:$0xf]  ;;  %v545_v49 = vld [vmem:[%s1306_s5 + $0x8] sm:$0xff]  ;;  %v1234_v53 = vld [vmem:[%s1307_s2] ss:$0 sm:$0xff] }
  0x1e   :  { %894 = vmatpush1.bf16.msra.mxu1 %v893_v4  ;;  %871 = vmatprep.subr.bf16.mxu0 %v870_v6  ;;  %v905_v50 = vpack.c.bf16 %v545_v49, %v544_v48 }
  0x1f   :  { %895 = vmatprep.subr.bf16.mxu1 %v910_v2 }
  0x21   :  { %873 = vmatpush3.bf16.msra.mxu0 %v872_v12 }
  0x22   :  { %897 = vmatpush1.bf16.msra.mxu1 %v896_v13  ;;  %902 = vmatprep.subr.bf16.mxu0 %v901_v16 }
  0x23   :  { %898 = vmatprep.subr.bf16.mxu1 %v910_v2  ;;  %v37_v2 = vld [vmem:[%s1304_s0 + $0x48] sm:$0xff] }
  0x24   :  { %207 = vmatmul.mubr.f32.vlgmr.msra.gmra.mrb[0].mxu0 %v28_v17 }
  0x25   :  { %211 = vmatprep.mubr.f32.mxu0 %v33_v19  ;;  %904 = vmatpush3.bf16.msra.mxu0 %v901_v16 }
  0x26   :  { %900 = vmatpush1.bf16.msra.mxu1 %v899_v18  ;;  %810 = vmatprep.subr.msk.mxu0 %vm411_vm1, %v378_v47 }
  0x27   :  { %906 = vmatprep.subr.bf16.mxu1 %v905_v50 }
  0x28   :  { %212 = vmatmul.mubr.f32.gmra.mrb[2].mxu0 %v32_v20 }
  0x29   :  { %312 = vmatmul.mubr.f32.vlgmr.msra.gmra.mrb[0].mxu1 %v30_v21  ;;  %216 = vmatprep.mubr.f32.mxu0 %v37_v2 }
  0x2a   :  { %701 = vmatprep.mubr.msk.f32.mxu1 %vm117_vm0, %v35_v22  ;;  %811 = vmatpush3.msk.msra.mxu0 %vm411_vm1, %v378_v47 }
  0x2b   :  { %908 = vmatpush3.bf16.msra.mxu1 %v905_v50 }
  0x2c   :  { %217 = vmatmul.mubr.f32.gmra.mrb[4].mxu0 %v36_v23 }
  0x2d   :  { %317 = vmatmul.mubr.f32.gmra.mrb[2].mxu1 %v34_v24  ;;  %221 = vmatprep.mubr.f32.mxu0 %v41_v25 }
  0x2e   :  { %702 = vmatprep.mubr.msk.f32.mxu1 %vm117_vm0, %v39_v26 }
  0x30   :  { %222 = vmatmul.mubr.f32.gmra.mrb[6].mxu0 %v40_v27 }
  0x31   :  { %322 = vmatmul.mubr.f32.gmra.mrb[4].mxu1 %v38_v28  ;;  %226 = vmatprep.mubr.f32.mxu0 %v45_v29 }
  0x32   :  { %703 = vmatprep.mubr.msk.f32.mxu1 %vm117_vm0, %v43_v30 }
  0x34   :  { %227 = vmatmul.mubr.f32.gmra.mrb[8].mxu0 %v44_v31 }
  0x35   :  { %327 = vmatmul.mubr.f32.gmra.mrb[6].mxu1 %v42_v32  ;;  %231 = vmatprep.mubr.f32.mxu0 %v49_v33 }
  0x36   :  { %704 = vmatprep.mubr.msk.f32.mxu1 %vm117_vm0, %v47_v34 }
  0x38   :  { %232 = vmatmul.mubr.f32.gmra.mrb[10].mxu0 %v48_v35 }
  0x39   :  { %332 = vmatmul.mubr.f32.gmra.mrb[8].mxu1 %v46_v36  ;;  %236 = vmatprep.mubr.f32.mxu0 %v53_v37 }
  0x3a   :  { %705 = vmatprep.mubr.msk.f32.mxu1 %vm117_vm0, %v51_v38 }
  0x3c   :  { %237 = vmatmul.mubr.f32.gmra.mrb[12].mxu0 %v52_v39 }
  0x3d   :  { %337 = vmatmul.mubr.f32.gmra.mrb[10].mxu1 %v50_v40  ;;  %241 = vmatprep.mubr.f32.mxu0 %v57_v41 }
  0x3e   :  { %706 = vmatprep.mubr.msk.f32.mxu1 %vm117_vm0, %v55_v42 }
  0x40   :  { %242 = vmatmul.mubr.f32.gmra.mrb[14].mxu0 %v56_v43 }
  0x41   :  { %342 = vmatmul.mubr.f32.gmra.mrb[12].mxu1 %v54_v44 }
  0x42   :  { %707 = vmatprep.mubr.msk.f32.mxu1 %vm117_vm0, %v59_v45 }
  0x45   :  { %347 = vmatmul.mubr.f32.gmra.mrb[14].mxu1 %v58_v46 }
  0xf7   :  { %v760_v51 = vpop.f32.mrb[0].mxu0 }
  0xf8   :  { %v761_v52 = vpop.f32.mrb[1].mxu0 }
  0xf9   :  { %v762_v54 = vadd.f32 %v761_v52, %v760_v51 }
  0xfb   :  { %v763_v55 = vpop.f32.mrb[2].mxu0  ;;  %v209_v56 = vadd.f32 %v762_v54, %v1234_v53 }
  0xfc   :  { %v313_v57 = vpop.f32.mrb[0].mxu1  ;;  %v764_v58 = vpop.f32.mrb[3].mxu0 }
  0xfd   :  { %v315_v59 = vpop.f32.mrb[1].mxu1  ;;  %v314_v60 = vadd.f32 %v313_v57, %v209_v56  ;;  %v765_v61 = vadd.f32 %v764_v58, %v763_v55 }
  0xff   :  { %vm352_vm2 = vcmp.ge.f32.partialorder %v314_v60, 0.0  ;;  %v360_v62 = vmul.f32 0.01, %v314_v60  ;;  %v766_v63 = vpop.f32.mrb[4].mxu0  ;;  %v214_v0 = vadd.f32 %v765_v61, %v1234_v53  ;;  %v546_v61 = vld [vmem:[%s1306_s5 + $0x10] sm:$0xf] }
 0x100   :  { %v318_v1 = vpop.f32.mrb[2].mxu1  ;;  %v767_v3 = vpop.f32.mrb[5].mxu0  ;;  %828 = vmatprep.subr.msk.mxu1 %vm411_vm1, %v546_v61 }
 0x101   :  { %v320_v4 = vpop.f32.mrb[3].mxu1  ;;  %v319_v5 = vadd.f32 %v318_v1, %v214_v0  ;;  %v768_v6 = vadd.f32 %v767_v3, %v766_v63  ;;  %v368_v7 = vsel %vm352_vm2, %v314_v60, %v360_v62  ;;  %829 = vmatpush3.msk.msra.mxu1 %vm411_vm1, %v546_v61  ;;  %v708_v62 = vld [vmem:[%s1309_s4] ss:$0 sm:$0xff] }
 0x102   :  { %812 = vmatprep.mubr.msk.f32.mxu0 %vm386_vm3, %v368_v7 }
 0x103   :  { %vm353_vm4 = vcmp.ge.f32.partialorder %v319_v5, 0.0  ;;  %v361_v8 = vmul.f32 0.01, %v319_v5  ;;  %v769_v9 = vpop.f32.mrb[6].mxu0  ;;  %v219_v10 = vadd.f32 %v768_v6, %v1234_v53 }
 0x104   :  { %v323_v11 = vpop.f32.mrb[4].mxu1  ;;  %v770_v12 = vpop.f32.mrb[7].mxu0 }
 0x105   :  { %v325_v13 = vpop.f32.mrb[5].mxu1  ;;  %v369_v14 = vsel %vm353_vm4, %v319_v5, %v361_v8  ;;  %v324_v15 = vadd.f32 %v323_v11, %v219_v10  ;;  %v771_v16 = vadd.f32 %v770_v12, %v769_v9  ;;  %vm686_vm4 = vcmask 7168  }
 0x106   :  { %813 = vmatmul.mubr.msk.f32.vlgmr.msra.gmra.mrb[16].mxu0 %vm386_vm3, %v369_v14 }
 0x107   :  { %vm354_vm5 = vcmp.ge.f32.partialorder %v324_v15, 0.0  ;;  %v362_v17 = vmul.f32 0.01, %v324_v15  ;;  %v772_v18 = vpop.f32.mrb[8].mxu0  ;;  %v224_v19 = vadd.f32 %v771_v16, %v1234_v53 }
 0x108   :  { %v328_v20 = vpop.f32.mrb[6].mxu1  ;;  %v773_v21 = vpop.f32.mrb[9].mxu0 }
 0x109   :  { %v330_v2 = vpop.f32.mrb[7].mxu1  ;;  %v329_v22 = vadd.f32 %v328_v20, %v224_v19  ;;  %v774_v23 = vadd.f32 %v773_v21, %v772_v18  ;;  %v370_v24 = vsel %vm354_vm5, %v324_v15, %v362_v17 }
 0x10a   :  { %815 = vmatprep.mubr.msk.f32.mxu0 %vm386_vm3, %v370_v24 }
 0x10b   :  { %vm355_vm6 = vcmp.ge.f32.partialorder %v329_v22, 0.0  ;;  %v363_v25 = vmul.f32 0.01, %v329_v22  ;;  %v775_v26 = vpop.f32.mrb[10].mxu0  ;;  %v229_v27 = vadd.f32 %v774_v23, %v1234_v53 }
 0x10c   :  { %v333_v28 = vpop.f32.mrb[8].mxu1  ;;  %v776_v29 = vpop.f32.mrb[11].mxu0 }
 0x10d   :  { %v335_v30 = vpop.f32.mrb[9].mxu1  ;;  %v334_v31 = vadd.f32 %v333_v28, %v229_v27  ;;  %v777_v32 = vadd.f32 %v776_v29, %v775_v26  ;;  %v371_v33 = vsel %vm355_vm6, %v329_v22, %v363_v25 }
 0x10e   :  { %816 = vmatmul.mubr.msk.f32.gmra.mrb[18].mxu0 %vm386_vm3, %v371_v33 }
 0x10f   :  { %vm356_vm7 = vcmp.ge.f32.partialorder %v334_v31, 0.0  ;;  %v364_v34 = vmul.f32 0.01, %v334_v31  ;;  %v778_v35 = vpop.f32.mrb[12].mxu0  ;;  %v234_v36 = vadd.f32 %v777_v32, %v1234_v53 }
 0x110   :  { %v338_v37 = vpop.f32.mrb[10].mxu1  ;;  %v779_v38 = vpop.f32.mrb[13].mxu0 }
 0x111   :  { %v340_v39 = vpop.f32.mrb[11].mxu1  ;;  %v339_v40 = vadd.f32 %v338_v37, %v234_v36  ;;  %v780_v41 = vadd.f32 %v779_v38, %v778_v35  ;;  %v372_v42 = vsel %vm356_vm7, %v334_v31, %v364_v34 }
 0x112   :  { %818 = vmatprep.mubr.msk.f32.mxu0 %vm386_vm3, %v372_v42 }
 0x113   :  { %vm357_vm8 = vcmp.ge.f32.partialorder %v339_v40, 0.0  ;;  %v365_v43 = vmul.f32 0.01, %v339_v40  ;;  %v781_v44 = vpop.f32.mrb[14].mxu0  ;;  %v239_v45 = vadd.f32 %v780_v41, %v1234_v53 }
 0x114   :  { %v343_v46 = vpop.f32.mrb[12].mxu1  ;;  %v782_v47 = vpop.f32.mrb[15].mxu0 }
 0x115   :  { %v345_v48 = vpop.f32.mrb[13].mxu1  ;;  %v344_v49 = vadd.f32 %v343_v46, %v239_v45  ;;  %v783_v50 = vadd.f32 %v782_v47, %v781_v44  ;;  %v373_v51 = vsel %vm357_vm8, %v339_v40, %v365_v43 }
 0x116   :  { %819 = vmatmul.mubr.msk.f32.gmra.mrb[20].mxu0 %vm386_vm3, %v373_v51 }
 0x117   :  { %vm358_vm9 = vcmp.ge.f32.partialorder %v344_v49, 0.0  ;;  %v366_v52 = vmul.f32 0.01, %v344_v49  ;;  %v244_v54 = vadd.f32 %v783_v50, %v1234_v53  ;;  %v12_v53 = vstv %s1308_s6 }
 0x118   :  { %v348_v55 = vpop.f32.mrb[14].mxu1  ;;  %13 = vst [vmem:[#allocation2] sm:$0x1] %v12_v53 }
 0x119   :  { %v350_v56 = vpop.f32.mrb[15].mxu1  ;;  %v349_v57 = vadd.f32 %v348_v55, %v244_v54  ;;  %v374_v58 = vsel %vm358_vm9, %v344_v49, %v366_v52 }
 0x11a   :  { %821 = vmatprep.mubr.msk.f32.mxu0 %vm386_vm3, %v374_v58 }
 0x11b   :  { %vm359_vm10 = vcmp.ge.f32.partialorder %v349_v57, 0.0  ;;  %v367_v59 = vmul.f32 0.01, %v349_v57 }
 0x11d   :  { %v375_v60 = vsel %vm359_vm10, %v349_v57, %v367_v59 }
 0x11e   :  { %822 = vmatmul.mubr.msk.f32.gmra.mrb[22].mxu0 %vm386_vm3, %v375_v60 }
 0x11f   :  { %v718_v31 = vld [vmem:[#allocation2] ss:$0 sm:$0xff] }
 0x1d9   :  { %v814_v63 = vpop.f32.mrb[16].mxu0 }
 0x1da   :  { %v487_v0 = vadd.f32 %v814_v63, %v708_v62  ;;  %v481_v1 = vpop.f32.mrb[17].mxu0 }
 0x1db   :  { %v482_v3 = vadd.f32 %v708_v62, %v481_v1 }
 0x1dc   :  { %v529_v4 = vmul.f32 0.01, %v487_v0  ;;  %vm521_vm11 = vcmp.ge.f32.partialorder %v487_v0, 0.0 }
 0x1dd   :  { %vm520_vm12 = vcmp.ge.f32.partialorder %v482_v3, 0.0  ;;  %v528_v5 = vmul.f32 0.01, %v482_v3 }
 0x1de   :  { %v537_v7 = vsel %vm521_vm11, %v487_v0, %v529_v4 }
 0x1df   :  { %v536_v6 = vsel %vm520_vm12, %v482_v3, %v528_v5 }
 0x1e0   :  { %830 = vmatprep.mubr.msk.f32.mxu1 %vm386_vm3, %v536_v6 }
 0x1e1   :  { %v817_v8 = vpop.f32.mrb[18].mxu0  ;;  %831 = vmatmul.mubr.msk.f32.vlgmr.msra.gmra.mrb[16].mxu1 %vm386_vm3, %v537_v7 }
 0x1e2   :  { %v497_v9 = vadd.f32 %v817_v8, %v708_v62  ;;  %v491_v10 = vpop.f32.mrb[19].mxu0 }
 0x1e3   :  { %v492_v11 = vadd.f32 %v708_v62, %v491_v10 }
 0x1e4   :  { %v531_v12 = vmul.f32 0.01, %v497_v9  ;;  %vm523_vm13 = vcmp.ge.f32.partialorder %v497_v9, 0.0 }
 0x1e5   :  { %vm522_vm14 = vcmp.ge.f32.partialorder %v492_v11, 0.0  ;;  %v530_v13 = vmul.f32 0.01, %v492_v11 }
 0x1e6   :  { %v539_v15 = vsel %vm523_vm13, %v497_v9, %v531_v12 }
 0x1e7   :  { %v538_v14 = vsel %vm522_vm14, %v492_v11, %v530_v13 }
 0x1e8   :  { %833 = vmatprep.mubr.msk.f32.mxu1 %vm386_vm3, %v538_v14 }
 0x1e9   :  { %v820_v16 = vpop.f32.mrb[20].mxu0  ;;  %834 = vmatmul.mubr.msk.f32.gmra.mrb[18].mxu1 %vm386_vm3, %v539_v15 }
 0x1ea   :  { %v507_v17 = vadd.f32 %v820_v16, %v708_v62  ;;  %v501_v18 = vpop.f32.mrb[21].mxu0 }
 0x1eb   :  { %v502_v19 = vadd.f32 %v708_v62, %v501_v18 }
 0x1ec   :  { %v533_v20 = vmul.f32 0.01, %v507_v17  ;;  %vm525_vm15 = vcmp.ge.f32.partialorder %v507_v17, 0.0 }
 0x1ed   :  { %vm524_vm0 = vcmp.ge.f32.partialorder %v502_v19, 0.0  ;;  %v532_v21 = vmul.f32 0.01, %v502_v19 }
 0x1ee   :  { %v541_v22 = vsel %vm525_vm15, %v507_v17, %v533_v20 }
 0x1ef   :  { %v540_v2 = vsel %vm524_vm0, %v502_v19, %v532_v21 }
 0x1f0   :  { %836 = vmatprep.mubr.msk.f32.mxu1 %vm386_vm3, %v540_v2 }
 0x1f1   :  { %v823_v23 = vpop.f32.mrb[22].mxu0  ;;  %837 = vmatmul.mubr.msk.f32.gmra.mrb[20].mxu1 %vm386_vm3, %v541_v22 }
 0x1f2   :  { %v517_v24 = vadd.f32 %v823_v23, %v708_v62  ;;  %v511_v25 = vpop.f32.mrb[23].mxu0 }
 0x1f3   :  { %v512_v26 = vadd.f32 %v708_v62, %v511_v25 }
 0x1f4   :  { %v535_v27 = vmul.f32 0.01, %v517_v24  ;;  %vm527_vm1 = vcmp.ge.f32.partialorder %v517_v24, 0.0 }
 0x1f5   :  { %vm526_vm2 = vcmp.ge.f32.partialorder %v512_v26, 0.0  ;;  %v534_v28 = vmul.f32 0.01, %v512_v26 }
 0x1f6   :  { %v543_v30 = vsel %vm527_vm1, %v517_v24, %v535_v27 }
 0x1f7   :  { %v542_v29 = vsel %vm526_vm2, %v512_v26, %v534_v28 }
 0x1f8   :  { %839 = vmatprep.mubr.msk.f32.mxu1 %vm386_vm3, %v542_v29 }
 0x1f9   :  { %840 = vmatmul.mubr.msk.f32.gmra.mrb[22].mxu1 %vm386_vm3, %v543_v30 }
 0x2b4   :  { %v832_v32 = vpop.f32.mrb[16].mxu1 }
 0x2b5   :  { %v653_v33 = vadd.f32 %v832_v32, %v718_v31  ;;  %v647_v34 = vpop.f32.mrb[17].mxu1 }
 0x2b6   :  { %v648_v35 = vadd.f32 %v718_v31, %v647_v34 }
 0x2b7   :  { %688 = vst.msk [vmem:[%s1310_s7 + $0x8] sm:$0xff] %vm686_vm4, %v653_v33 }
 0x2b8   :  { %687 = vst.msk [vmem:[%s1310_s7] sm:$0xff] %vm686_vm4, %v648_v35 }
 0x2bc   :  { %v835_v36 = vpop.f32.mrb[18].mxu1 }
 0x2bd   :  { %v663_v37 = vadd.f32 %v835_v36, %v718_v31  ;;  %v657_v38 = vpop.f32.mrb[19].mxu1 }
 0x2be   :  { %v658_v39 = vadd.f32 %v718_v31, %v657_v38 }
 0x2bf   :  { %690 = vst.msk [vmem:[%s1310_s7 + $0x18] sm:$0xff] %vm686_vm4, %v663_v37 }
 0x2c0   :  { %689 = vst.msk [vmem:[%s1310_s7 + $0x10] sm:$0xff] %vm686_vm4, %v658_v39 }
 0x2c4   :  { %v838_v40 = vpop.f32.mrb[20].mxu1 }
 0x2c5   :  { %v673_v41 = vadd.f32 %v838_v40, %v718_v31  ;;  %v667_v42 = vpop.f32.mrb[21].mxu1 }
 0x2c6   :  { %v668_v43 = vadd.f32 %v718_v31, %v667_v42 }
 0x2c7   :  { %692 = vst.msk [vmem:[%s1310_s7 + $0x28] sm:$0xff] %vm686_vm4, %v673_v41 }
 0x2c8   :  { %691 = vst.msk [vmem:[%s1310_s7 + $0x20] sm:$0xff] %vm686_vm4, %v668_v43 }
 0x2cc   :  { %v841_v44 = vpop.f32.mrb[22].mxu1 }
 0x2cd   :  { %v683_v45 = vadd.f32 %v841_v44, %v718_v31  ;;  %v677_v46 = vpop.f32.mrb[23].mxu1 }
 0x2ce   :  { %v678_v47 = vadd.f32 %v718_v31, %v677_v46 }
 0x2cf   :  { %694 = vst.msk [vmem:[%s1310_s7 + $0x38] sm:$0xff] %vm686_vm4, %v683_v45 }
 0x2d0   :  { %693 = vst.msk [vmem:[%s1310_s7 + $0x30] sm:$0xff] %vm686_vm4, %v678_v47 }

</bundles_post_ra>
